<compile_context>
chip_gen: v7x
topology: tpu7x:2x2x1
jax: 0.10.0
libtpu: 0.0.40
codegen_flags: <defaults>
</compile_context>

<pallas_src>
import functools

import jax
import jax.numpy as jnp
import numpy as np
from jax.experimental import pallas as pl
from jax.experimental.pallas import tpu as pltpu


def _round_up(n, m):
    return ((n + m - 1) // m) * m


# ----------------------------------------------------------------------------
# Fused kernel: one token tile -> z, z2 (latent halves) and B1(z), B1(z2) (pred halves).
# All (tiny, padded) weights stay resident in VMEM; MXU in bf16 with f32 accumulation;
# bias-add / ReLU in f32 (v5e has no bf16 VPU path).
# ----------------------------------------------------------------------------
def _fused_kernel(x_ref,
                  f1_w1, f1_b1, f1_w2, f1_b2,          # F1
                  f2b1_w1, f2_b1, f2_w2, f2_b2,        # F2 (layer-1 fused with B1 layer-1)
                  b1_w1, b1_b1, b1_w2, b1_b2,          # B1
                  lat_ref, pred_ref):
    Hp = f2_b1.shape[-1]                               # lane-padded hidden dim (static)

    x = x_ref[...].astype(jnp.bfloat16)                # (tm, D)

    # ---- F1(x) ----
    h1 = jnp.dot(x, f1_w1[...], preferred_element_type=jnp.float32)
    h1 = jnp.maximum(h1 + f1_b1[...], 0.0)
    z = jnp.dot(h1.astype(jnp.bfloat16), f1_w2[...],
                preferred_element_type=jnp.float32) + f1_b2[...]
    z_bf = z.astype(jnp.bfloat16)

    # ---- fused first layers of F2 and B1 (shared LHS z): one (tm, 2*Hp) MXU pass ----
    hf = jnp.dot(z_bf, f2b1_w1[...], preferred_element_type=jnp.float32)
    h_f2 = jnp.maximum(hf[:, :Hp] + f2_b1[...], 0.0)         # F2 hidden
    h_b1z = jnp.maximum(hf[:, Hp:] + b1_b1[...], 0.0)        # B1(z) hidden

    z2 = jnp.dot(h_f2.astype(jnp.bfloat16), f2_w2[...],
                 preferred_element_type=jnp.float32) + f2_b2[...]
    z2_bf = z2.astype(jnp.bfloat16)
    pz = jnp.dot(h_b1z.astype(jnp.bfloat16), b1_w2[...],
                 preferred_element_type=jnp.float32) + b1_b2[...]

    # ---- B1(z2) ----
    h_b1z2 = jnp.dot(z2_bf, b1_w1[...], preferred_element_type=jnp.float32)
    h_b1z2 = jnp.maximum(h_b1z2 + b1_b1[...], 0.0)
    pz2 = jnp.dot(h_b1z2.astype(jnp.bfloat16), b1_w2[...],
                  preferred_element_type=jnp.float32) + b1_b2[...]

    # Direct placement of the dim=1 concat: out arrays are (B, 2, T, D); index 0 is
    # the first half (z / B1(z)), index 1 the second half (z2 / B1(z2)).
    lat_ref[0] = z_bf
    lat_ref[1] = z2_bf
    pred_ref[0] = pz.astype(jnp.bfloat16)
    pred_ref[1] = pz2.astype(jnp.bfloat16)


# ----------------------------------------------------------------------------
# Wrapper.
# ----------------------------------------------------------------------------
def _pad_block_params(params, Hp):
    """Zero-pad hidden dim to Hp (lane-aligned); weights -> bf16, biases -> f32."""
    w1, b1, w2, b2 = params
    D, H = w1.shape
    w1p = jnp.zeros((D, Hp), jnp.bfloat16).at[:, :H].set(w1.astype(jnp.bfloat16))
    b1p = jnp.zeros((1, Hp), jnp.float32).at[:, :H].set(b1.astype(jnp.float32).reshape(1, H))
    w2p = jnp.zeros((Hp, D), jnp.bfloat16).at[:H, :].set(w2.astype(jnp.bfloat16))
    b2p = b2.astype(jnp.float32).reshape(1, D)
    return w1p, b1p, w2p, b2p


@functools.partial(jax.jit, static_argnames=("tm_max",))
def two_forward_one_back_forward(x, params_f1, params_f2, params_b1, *, tm_max=1024):
    """x: (B, T, D).  Returns (latent (B, 2T, D), pred (B, 2T, D)) in bf16."""
    B, T, D = x.shape
    H = params_f1[0].shape[1]
    Hp = _round_up(H, 128)                         # lane-aligned hidden dim

    # Token-tile sizing: multiple of 8, divides T_pad, padding waste bounded (<~12.5%).
    T8 = _round_up(T, 8)
    tm = max(8, (min(tm_max, T8) // 8) * 8)
    T_pad = _round_up(T8, tm)
    while tm > 8 and (T_pad - T8) * 8 > T8:
        tm = max(8, ((tm // 2) // 8) * 8)
        T_pad = _round_up(T8, tm)

    # Only pad the token axis when T is ragged (demo: T=8 -> no wrapper pad pass at all).
    if T_pad != T:
        x_in = jnp.zeros((B, T_pad, D), x.dtype).at[:, :T, :].set(x)
    else:
        x_in = x

    pf1 = _pad_block_params(params_f1, Hp)
    pf2 = _pad_block_params(params_f2, Hp)
    pb1 = _pad_block_params(params_b1, Hp)
    # Fuse F2-layer1 and B1-layer1 weights (shared LHS z) into one (D, 2*Hp) RHS.
    f2b1_w1 = jnp.concatenate([pf2[0], pb1[0]], axis=1)

    x_spec = pl.BlockSpec((None, tm, D), lambda b, t: (b, t, 0))

    def _const(shape):
        return pl.BlockSpec(shape, lambda b, t: (0, 0))     # resident weights/biases

    in_specs = [
        x_spec,
        _const((D, Hp)), _const((1, Hp)), _const((Hp, D)), _const((1, D)),       # F1
        _const((D, 2 * Hp)), _const((1, Hp)), _const((Hp, D)), _const((1, D)),   # F2 (+fused B1 w1)
        _const((D, Hp)), _const((1, Hp)), _const((Hp, D)), _const((1, D)),       # B1
    ]
    out_spec = pl.BlockSpec((None, 2, tm, D), lambda b, t: (b, 0, t, 0))

    lat4, pred4 = pl.pallas_call(
        _fused_kernel,
        out_shape=[jax.ShapeDtypeStruct((B, 2, T_pad, D), jnp.bfloat16)] * 2,
        grid_spec=pltpu.PrefetchScalarGridSpec(
            num_scalar_prefetch=0,
            grid=(B, T_pad // tm),
            in_specs=in_specs,
            out_specs=[out_spec, out_spec],
        ),
        compiler_params=pltpu.CompilerParams(
            dimension_semantics=("parallel", "parallel"),   # both axes shardable across TCs (v7x)
        ),
    )(x_in,
      pf1[0], pf1[1], pf1[2], pf1[3],
      f2b1_w1, pf2[1], pf2[2], pf2[3],
      pb1[0], pb1[1], pb1[2], pb1[3])

    if T_pad != T:
        lat4 = lat4[:, :, :T, :]
        pred4 = pred4[:, :, :T, :]
    # (B, 2, T, D) -> (B, 2T, D) is a free row-major reshape == cat([z, z2], dim=1).
    latent = lat4.reshape(B, 2 * T, D)
    pred = pred4.reshape(B, 2 * T, D)
    return latent, pred


# ----------------------------------------------------------------------------
# Pure-JAX reference with the same bf16-input / f32-accumulation precision.
# ----------------------------------------------------------------------------
def _ref_block(x_bf, params):
    w1, b1, w2, b2 = params
    h = jnp.dot(x_bf, w1.astype(jnp.bfloat16), preferred_element_type=jnp.float32)
    h = jnp.maximum(h + b1.astype(jnp.float32), 0.0)
    y = jnp.dot(h.astype(jnp.bfloat16), w2.astype(jnp.bfloat16),
                preferred_element_type=jnp.float32)
    return y + b2.astype(jnp.float32)


def _ref_forward(x, pf1, pf2, pb1):
    B, T, D = x.shape
    x2 = x.reshape(B * T, D).astype(jnp.bfloat16)
    z = _ref_block(x2, pf1)
    z_bf = z.astype(jnp.bfloat16)
    z2 = _ref_block(z_bf, pf2)
    z2_bf = z2.astype(jnp.bfloat16)
    pz = _ref_block(z_bf, pb1).astype(jnp.bfloat16)
    pz2 = _ref_block(z2_bf, pb1).astype(jnp.bfloat16)
    latent = jnp.concatenate([z_bf.reshape(B, T, D), z2_bf.reshape(B, T, D)], axis=1)
    pred = jnp.concatenate([pz.reshape(B, T, D), pz2.reshape(B, T, D)], axis=1)
    return latent, pred


def init_block_params(key, d, h):
    k1, k2, k3, k4 = jax.random.split(key, 4)
    w1 = jax.random.normal(k1, (d, h), jnp.float32) * 0.1
    b1 = jax.random.normal(k2, (1, h), jnp.float32) * 0.01
    w2 = jax.random.normal(k3, (h, d), jnp.float32) * 0.1
    b2 = jax.random.normal(k4, (1, d), jnp.float32) * 0.01
    return (w1, b1, w2, b2)


if __name__ == "__main__":
    B, T, D, H = 2, 8, 16, 32          # token_depth = 16

    key = jax.random.PRNGKey(0)
    kx, kf1, kf2, kb1 = jax.random.split(key, 4)

    x = jax.random.normal(kx, (B, T, D), jnp.float32)
    params_f1 = init_block_params(kf1, D, H)
    params_f2 = init_block_params(kf2, D, H)
    params_b1 = init_block_params(kb1, D, H)

    latent, pred = two_forward_one_back_forward(x, params_f1, params_f2, params_b1)
    latent = jax.block_until_ready(latent)
    pred = jax.block_until_ready(pred)

    # shapes match module semantics (cat along dim=1)
    assert latent.shape == (B, 2 * T, D)
    assert pred.shape == (B, 2 * T, D)
    assert bool(jnp.all(jnp.isfinite(latent.astype(jnp.float32))))
    assert bool(jnp.all(jnp.isfinite(pred.astype(jnp.float32))))

    # numerical check against a same-precision pure-JAX reference
    latent_ref, pred_ref = _ref_forward(x, params_f1, params_f2, params_b1)
    np.testing.assert_allclose(np.asarray(latent, dtype=np.float32),
                               np.asarray(latent_ref, dtype=np.float32),
                               rtol=2e-2, atol=2e-2)
    np.testing.assert_allclose(np.asarray(pred, dtype=np.float32),
                               np.asarray(pred_ref, dtype=np.float32),
                               rtol=2e-2, atol=2e-2)

    print("KERNEL_OK")
</pallas_src>

<mosaic_0001>
module attributes {stable_mosaic.version = 11 : i64} {
  func.func @_fused_kernel(%arg0: i32, %arg1: i32, %arg2: memref<1x8x16xf32, #tpu.memory_space<vmem>>, %arg3: memref<16x128xbf16, #tpu.memory_space<vmem>>, %arg4: memref<1x128xf32, #tpu.memory_space<vmem>>, %arg5: memref<128x16xbf16, #tpu.memory_space<vmem>>, %arg6: memref<1x16xf32, #tpu.memory_space<vmem>>, %arg7: memref<16x256xbf16, #tpu.memory_space<vmem>>, %arg8: memref<1x128xf32, #tpu.memory_space<vmem>>, %arg9: memref<128x16xbf16, #tpu.memory_space<vmem>>, %arg10: memref<1x16xf32, #tpu.memory_space<vmem>>, %arg11: memref<16x128xbf16, #tpu.memory_space<vmem>>, %arg12: memref<1x128xf32, #tpu.memory_space<vmem>>, %arg13: memref<128x16xbf16, #tpu.memory_space<vmem>>, %arg14: memref<1x16xf32, #tpu.memory_space<vmem>>, %arg15: memref<1x2x8x16xbf16, #tpu.memory_space<vmem>>, %arg16: memref<1x2x8x16xbf16, #tpu.memory_space<vmem>>) attributes {dimension_semantics = [#tpu.dimension_semantics<parallel>, #tpu.dimension_semantics<parallel>], iteration_bounds = array<i64: 2, 1>, scalar_prefetch = 0 : i64, scratch_operands = 0 : i64, tpu.core_type = #tpu.core_type<tc>, window_params = [{transform_indices = @transform_0, window_bounds = array<i64: 1, 8, 16>}, {pipeline_mode = #tpu.pipeline_mode<synchronous>, transform_indices = @transform_1, window_bounds = array<i64: 16, 128>}, {pipeline_mode = #tpu.pipeline_mode<synchronous>, transform_indices = @transform_2, window_bounds = array<i64: 1, 128>}, {pipeline_mode = #tpu.pipeline_mode<synchronous>, transform_indices = @transform_3, window_bounds = array<i64: 128, 16>}, {pipeline_mode = #tpu.pipeline_mode<synchronous>, transform_indices = @transform_4, window_bounds = array<i64: 1, 16>}, {pipeline_mode = #tpu.pipeline_mode<synchronous>, transform_indices = @transform_5, window_bounds = array<i64: 16, 256>}, {pipeline_mode = #tpu.pipeline_mode<synchronous>, transform_indices = @transform_6, window_bounds = array<i64: 1, 128>}, {pipeline_mode = #tpu.pipeline_mode<synchronous>, transform_indices = @transform_7, window_bounds = array<i64: 128, 16>}, {pipeline_mode = #tpu.pipeline_mode<synchronous>, transform_indices = @transform_8, window_bounds = array<i64: 1, 16>}, {pipeline_mode = #tpu.pipeline_mode<synchronous>, transform_indices = @transform_9, window_bounds = array<i64: 16, 128>}, {pipeline_mode = #tpu.pipeline_mode<synchronous>, transform_indices = @transform_10, window_bounds = array<i64: 1, 128>}, {pipeline_mode = #tpu.pipeline_mode<synchronous>, transform_indices = @transform_11, window_bounds = array<i64: 128, 16>}, {pipeline_mode = #tpu.pipeline_mode<synchronous>, transform_indices = @transform_12, window_bounds = array<i64: 1, 16>}, {transform_indices = @transform_13, window_bounds = array<i64: 1, 2, 8, 16>}, {transform_indices = @transform_14, window_bounds = array<i64: 1, 2, 8, 16>}]} {
    %c0 = arith.constant 0 : index
    %c0_0 = arith.constant 0 : index
    %c0_1 = arith.constant 0 : index
    %0 = vector.load %arg2[%c0, %c0_0, %c0_1] : memref<1x8x16xf32, #tpu.memory_space<vmem>>, vector<1x8x16xf32>
    %1 = vector.shape_cast %0 : vector<1x8x16xf32> to vector<8x16xf32>
    %2 = arith.truncf %1 : vector<8x16xf32> to vector<8x16xbf16>
    %c0_2 = arith.constant 0 : index
    %c0_3 = arith.constant 0 : index
    %3 = vector.load %arg3[%c0_2, %c0_3] : memref<16x128xbf16, #tpu.memory_space<vmem>>, vector<16x128xbf16>
    %cst = arith.constant dense<0.000000e+00> : vector<8x128xf32>
    %4 = tpu.matmul %2, %3, %cst {dimension_numbers = #tpu.dot_dimension_numbers<[1], [0], [0], [1], [0, 0, 1, 1], [], []>} : vector<8x16xbf16>, vector<16x128xbf16>, vector<8x128xf32> -> vector<8x128xf32>
    %c0_4 = arith.constant 0 : index
    %c0_5 = arith.constant 0 : index
    %5 = vector.load %arg4[%c0_4, %c0_5] : memref<1x128xf32, #tpu.memory_space<vmem>>, vector<1x128xf32>
    %6 = vector.broadcast %5 : vector<1x128xf32> to vector<8x128xf32>
    %7 = arith.addf %4, %6 : vector<8x128xf32>
    %cst_6 = arith.constant 0.000000e+00 : f32
    %8 = vector.broadcast %cst_6 : f32 to vector<8x128xf32>
    %9 = arith.maximumf %7, %8 : vector<8x128xf32>
    %10 = arith.truncf %9 : vector<8x128xf32> to vector<8x128xbf16>
    %c0_7 = arith.constant 0 : index
    %c0_8 = arith.constant 0 : index
    %11 = vector.load %arg5[%c0_7, %c0_8] : memref<128x16xbf16, #tpu.memory_space<vmem>>, vector<128x16xbf16>
    %cst_9 = arith.constant dense<0.000000e+00> : vector<8x16xf32>
    %12 = tpu.matmul %10, %11, %cst_9 {dimension_numbers = #tpu.dot_dimension_numbers<[1], [0], [0], [1], [0, 0, 1, 1], [], []>} : vector<8x128xbf16>, vector<128x16xbf16>, vector<8x16xf32> -> vector<8x16xf32>
    %c0_10 = arith.constant 0 : index
    %c0_11 = arith.constant 0 : index
    %13 = vector.load %arg6[%c0_10, %c0_11] : memref<1x16xf32, #tpu.memory_space<vmem>>, vector<1x16xf32>
    %14 = vector.broadcast %13 : vector<1x16xf32> to vector<8x16xf32>
    %15 = arith.addf %12, %14 : vector<8x16xf32>
    %16 = arith.truncf %15 : vector<8x16xf32> to vector<8x16xbf16>
    %c0_12 = arith.constant 0 : index
    %c0_13 = arith.constant 0 : index
    %17 = vector.load %arg7[%c0_12, %c0_13] : memref<16x256xbf16, #tpu.memory_space<vmem>>, vector<16x256xbf16>
    %cst_14 = arith.constant dense<0.000000e+00> : vector<8x256xf32>
    %18 = tpu.matmul %16, %17, %cst_14 {dimension_numbers = #tpu.dot_dimension_numbers<[1], [0], [0], [1], [0, 0, 1, 1], [], []>} : vector<8x16xbf16>, vector<16x256xbf16>, vector<8x256xf32> -> vector<8x256xf32>
    %19 = vector.extract_strided_slice %18 {offsets = [0, 0], sizes = [8, 128], strides = [1, 1]} : vector<8x256xf32> to vector<8x128xf32>
    %c0_15 = arith.constant 0 : index
    %c0_16 = arith.constant 0 : index
    %20 = vector.load %arg8[%c0_15, %c0_16] : memref<1x128xf32, #tpu.memory_space<vmem>>, vector<1x128xf32>
    %21 = vector.broadcast %20 : vector<1x128xf32> to vector<8x128xf32>
    %22 = arith.addf %19, %21 : vector<8x128xf32>
    %cst_17 = arith.constant 0.000000e+00 : f32
    %23 = vector.broadcast %cst_17 : f32 to vector<8x128xf32>
    %24 = arith.maximumf %22, %23 : vector<8x128xf32>
    %25 = vector.extract_strided_slice %18 {offsets = [0, 128], sizes = [8, 128], strides = [1, 1]} : vector<8x256xf32> to vector<8x128xf32>
    %c0_18 = arith.constant 0 : index
    %c0_19 = arith.constant 0 : index
    %26 = vector.load %arg12[%c0_18, %c0_19] : memref<1x128xf32, #tpu.memory_space<vmem>>, vector<1x128xf32>
    %27 = vector.broadcast %26 : vector<1x128xf32> to vector<8x128xf32>
    %28 = arith.addf %25, %27 : vector<8x128xf32>
    %cst_20 = arith.constant 0.000000e+00 : f32
    %29 = vector.broadcast %cst_20 : f32 to vector<8x128xf32>
    %30 = arith.maximumf %28, %29 : vector<8x128xf32>
    %31 = arith.truncf %24 : vector<8x128xf32> to vector<8x128xbf16>
    %c0_21 = arith.constant 0 : index
    %c0_22 = arith.constant 0 : index
    %32 = vector.load %arg9[%c0_21, %c0_22] : memref<128x16xbf16, #tpu.memory_space<vmem>>, vector<128x16xbf16>
    %cst_23 = arith.constant dense<0.000000e+00> : vector<8x16xf32>
    %33 = tpu.matmul %31, %32, %cst_23 {dimension_numbers = #tpu.dot_dimension_numbers<[1], [0], [0], [1], [0, 0, 1, 1], [], []>} : vector<8x128xbf16>, vector<128x16xbf16>, vector<8x16xf32> -> vector<8x16xf32>
    %c0_24 = arith.constant 0 : index
    %c0_25 = arith.constant 0 : index
    %34 = vector.load %arg10[%c0_24, %c0_25] : memref<1x16xf32, #tpu.memory_space<vmem>>, vector<1x16xf32>
    %35 = vector.broadcast %34 : vector<1x16xf32> to vector<8x16xf32>
    %36 = arith.addf %33, %35 : vector<8x16xf32>
    %37 = arith.truncf %36 : vector<8x16xf32> to vector<8x16xbf16>
    %38 = arith.truncf %30 : vector<8x128xf32> to vector<8x128xbf16>
    %c0_26 = arith.constant 0 : index
    %c0_27 = arith.constant 0 : index
    %39 = vector.load %arg13[%c0_26, %c0_27] : memref<128x16xbf16, #tpu.memory_space<vmem>>, vector<128x16xbf16>
    %cst_28 = arith.constant dense<0.000000e+00> : vector<8x16xf32>
    %40 = tpu.matmul %38, %39, %cst_28 {dimension_numbers = #tpu.dot_dimension_numbers<[1], [0], [0], [1], [0, 0, 1, 1], [], []>} : vector<8x128xbf16>, vector<128x16xbf16>, vector<8x16xf32> -> vector<8x16xf32>
    %c0_29 = arith.constant 0 : index
    %c0_30 = arith.constant 0 : index
    %41 = vector.load %arg14[%c0_29, %c0_30] : memref<1x16xf32, #tpu.memory_space<vmem>>, vector<1x16xf32>
    %42 = vector.broadcast %41 : vector<1x16xf32> to vector<8x16xf32>
    %43 = arith.addf %40, %42 : vector<8x16xf32>
    %c0_31 = arith.constant 0 : index
    %c0_32 = arith.constant 0 : index
    %44 = vector.load %arg11[%c0_31, %c0_32] : memref<16x128xbf16, #tpu.memory_space<vmem>>, vector<16x128xbf16>
    %cst_33 = arith.constant dense<0.000000e+00> : vector<8x128xf32>
    %45 = tpu.matmul %37, %44, %cst_33 {dimension_numbers = #tpu.dot_dimension_numbers<[1], [0], [0], [1], [0, 0, 1, 1], [], []>} : vector<8x16xbf16>, vector<16x128xbf16>, vector<8x128xf32> -> vector<8x128xf32>
    %c0_34 = arith.constant 0 : index
    %c0_35 = arith.constant 0 : index
    %46 = vector.load %arg12[%c0_34, %c0_35] : memref<1x128xf32, #tpu.memory_space<vmem>>, vector<1x128xf32>
    %47 = vector.broadcast %46 : vector<1x128xf32> to vector<8x128xf32>
    %48 = arith.addf %45, %47 : vector<8x128xf32>
    %cst_36 = arith.constant 0.000000e+00 : f32
    %49 = vector.broadcast %cst_36 : f32 to vector<8x128xf32>
    %50 = arith.maximumf %48, %49 : vector<8x128xf32>
    %51 = arith.truncf %50 : vector<8x128xf32> to vector<8x128xbf16>
    %c0_37 = arith.constant 0 : index
    %c0_38 = arith.constant 0 : index
    %52 = vector.load %arg13[%c0_37, %c0_38] : memref<128x16xbf16, #tpu.memory_space<vmem>>, vector<128x16xbf16>
    %cst_39 = arith.constant dense<0.000000e+00> : vector<8x16xf32>
    %53 = tpu.matmul %51, %52, %cst_39 {dimension_numbers = #tpu.dot_dimension_numbers<[1], [0], [0], [1], [0, 0, 1, 1], [], []>} : vector<8x128xbf16>, vector<128x16xbf16>, vector<8x16xf32> -> vector<8x16xf32>
    %c0_40 = arith.constant 0 : index
    %c0_41 = arith.constant 0 : index
    %54 = vector.load %arg14[%c0_40, %c0_41] : memref<1x16xf32, #tpu.memory_space<vmem>>, vector<1x16xf32>
    %55 = vector.broadcast %54 : vector<1x16xf32> to vector<8x16xf32>
    %56 = arith.addf %53, %55 : vector<8x16xf32>
    %c0_42 = arith.constant 0 : index
    %c0_43 = arith.constant 0 : index
    %c0_44 = arith.constant 0 : index
    %c0_45 = arith.constant 0 : index
    %57 = vector.load %arg15[%c0_42, %c0_43, %c0_44, %c0_45] : memref<1x2x8x16xbf16, #tpu.memory_space<vmem>>, vector<1x1x8x16xbf16>
    %58 = vector.shape_cast %57 : vector<1x1x8x16xbf16> to vector<8x16xbf16>
    %59 = vector.shape_cast %16 : vector<8x16xbf16> to vector<1x1x8x16xbf16>
    tpu.vector_store %arg15[%c0_42, %c0_43, %c0_44, %c0_45], %59 {strides = array<i32>} : memref<1x2x8x16xbf16, #tpu.memory_space<vmem>>, vector<1x1x8x16xbf16>,
    %c0_46 = arith.constant 0 : index
    %c1 = arith.constant 1 : index
    %c0_47 = arith.constant 0 : index
    %c0_48 = arith.constant 0 : index
    %60 = vector.load %arg15[%c0_46, %c1, %c0_47, %c0_48] : memref<1x2x8x16xbf16, #tpu.memory_space<vmem>>, vector<1x1x8x16xbf16>
    %61 = vector.shape_cast %60 : vector<1x1x8x16xbf16> to vector<8x16xbf16>
    %62 = vector.shape_cast %37 : vector<8x16xbf16> to vector<1x1x8x16xbf16>
    tpu.vector_store %arg15[%c0_46, %c1, %c0_47, %c0_48], %62 {strides = array<i32>} : memref<1x2x8x16xbf16, #tpu.memory_space<vmem>>, vector<1x1x8x16xbf16>,
    %63 = arith.truncf %43 : vector<8x16xf32> to vector<8x16xbf16>
    %c0_49 = arith.constant 0 : index
    %c0_50 = arith.constant 0 : index
    %c0_51 = arith.constant 0 : index
    %c0_52 = arith.constant 0 : index
    %64 = vector.load %arg16[%c0_49, %c0_50, %c0_51, %c0_52] : memref<1x2x8x16xbf16, #tpu.memory_space<vmem>>, vector<1x1x8x16xbf16>
    %65 = vector.shape_cast %64 : vector<1x1x8x16xbf16> to vector<8x16xbf16>
    %66 = vector.shape_cast %63 : vector<8x16xbf16> to vector<1x1x8x16xbf16>
    tpu.vector_store %arg16[%c0_49, %c0_50, %c0_51, %c0_52], %66 {strides = array<i32>} : memref<1x2x8x16xbf16, #tpu.memory_space<vmem>>, vector<1x1x8x16xbf16>,
    %67 = arith.truncf %56 : vector<8x16xf32> to vector<8x16xbf16>
    %c0_53 = arith.constant 0 : index
    %c1_54 = arith.constant 1 : index
    %c0_55 = arith.constant 0 : index
    %c0_56 = arith.constant 0 : index
    %68 = vector.load %arg16[%c0_53, %c1_54, %c0_55, %c0_56] : memref<1x2x8x16xbf16, #tpu.memory_space<vmem>>, vector<1x1x8x16xbf16>
    %69 = vector.shape_cast %68 : vector<1x1x8x16xbf16> to vector<8x16xbf16>
    %70 = vector.shape_cast %67 : vector<8x16xbf16> to vector<1x1x8x16xbf16>
    tpu.vector_store %arg16[%c0_53, %c1_54, %c0_55, %c0_56], %70 {strides = array<i32>} : memref<1x2x8x16xbf16, #tpu.memory_space<vmem>>, vector<1x1x8x16xbf16>,
    return
  }
  func.func @transform_0(%arg0: i32, %arg1: i32) -> (i32, i32, i32) {
    %c0_i32 = arith.constant 0 : i32
    %c0_i32_0 = arith.constant 0 : i32
    return %arg0, %arg1, %c0_i32 : i32, i32, i32
  }
  func.func @transform_1(%arg0: i32, %arg1: i32) -> (i32, i32) {
    %c0_i32 = arith.constant 0 : i32
    %c0_i32_0 = arith.constant 0 : i32
    %c0_i32_1 = arith.constant 0 : i32
    return %c0_i32, %c0_i32_0 : i32, i32
  }
  func.func @transform_2(%arg0: i32, %arg1: i32) -> (i32, i32) {
    %c0_i32 = arith.constant 0 : i32
    %c0_i32_0 = arith.constant 0 : i32
    %c0_i32_1 = arith.constant 0 : i32
    return %c0_i32, %c0_i32_0 : i32, i32
  }
  func.func @transform_3(%arg0: i32, %arg1: i32) -> (i32, i32) {
    %c0_i32 = arith.constant 0 : i32
    %c0_i32_0 = arith.constant 0 : i32
    %c0_i32_1 = arith.constant 0 : i32
    return %c0_i32, %c0_i32_0 : i32, i32
  }
  func.func @transform_4(%arg0: i32, %arg1: i32) -> (i32, i32) {
    %c0_i32 = arith.constant 0 : i32
    %c0_i32_0 = arith.constant 0 : i32
    %c0_i32_1 = arith.constant 0 : i32
    return %c0_i32, %c0_i32_0 : i32, i32
  }
  func.func @transform_5(%arg0: i32, %arg1: i32) -> (i32, i32) {
    %c0_i32 = arith.constant 0 : i32
    %c0_i32_0 = arith.constant 0 : i32
    %c0_i32_1 = arith.constant 0 : i32
    return %c0_i32, %c0_i32_0 : i32, i32
  }
  func.func @transform_6(%arg0: i32, %arg1: i32) -> (i32, i32) {
    %c0_i32 = arith.constant 0 : i32
    %c0_i32_0 = arith.constant 0 : i32
    %c0_i32_1 = arith.constant 0 : i32
    return %c0_i32, %c0_i32_0 : i32, i32
  }
  func.func @transform_7(%arg0: i32, %arg1: i32) -> (i32, i32) {
    %c0_i32 = arith.constant 0 : i32
    %c0_i32_0 = arith.constant 0 : i32
    %c0_i32_1 = arith.constant 0 : i32
    return %c0_i32, %c0_i32_0 : i32, i32
  }
  func.func @transform_8(%arg0: i32, %arg1: i32) -> (i32, i32) {
    %c0_i32 = arith.constant 0 : i32
    %c0_i32_0 = arith.constant 0 : i32
    %c0_i32_1 = arith.constant 0 : i32
    return %c0_i32, %c0_i32_0 : i32, i32
  }
  func.func @transform_9(%arg0: i32, %arg1: i32) -> (i32, i32) {
    %c0_i32 = arith.constant 0 : i32
    %c0_i32_0 = arith.constant 0 : i32
    %c0_i32_1 = arith.constant 0 : i32
    return %c0_i32, %c0_i32_0 : i32, i32
  }
  func.func @transform_10(%arg0: i32, %arg1: i32) -> (i32, i32) {
    %c0_i32 = arith.constant 0 : i32
    %c0_i32_0 = arith.constant 0 : i32
    %c0_i32_1 = arith.constant 0 : i32
    return %c0_i32, %c0_i32_0 : i32, i32
  }
  func.func @transform_11(%arg0: i32, %arg1: i32) -> (i32, i32) {
    %c0_i32 = arith.constant 0 : i32
    %c0_i32_0 = arith.constant 0 : i32
    %c0_i32_1 = arith.constant 0 : i32
    return %c0_i32, %c0_i32_0 : i32, i32
  }
  func.func @transform_12(%arg0: i32, %arg1: i32) -> (i32, i32) {
    %c0_i32 = arith.constant 0 : i32
    %c0_i32_0 = arith.constant 0 : i32
    %c0_i32_1 = arith.constant 0 : i32
    return %c0_i32, %c0_i32_0 : i32, i32
  }
  func.func @transform_13(%arg0: i32, %arg1: i32) -> (i32, i32, i32, i32) {
    %c0_i32 = arith.constant 0 : i32
    %c0_i32_0 = arith.constant 0 : i32
    %c0_i32_1 = arith.constant 0 : i32
    return %arg0, %c0_i32, %arg1, %c0_i32_0 : i32, i32, i32, i32
  }
  func.func @transform_14(%arg0: i32, %arg1: i32) -> (i32, i32, i32, i32) {
    %c0_i32 = arith.constant 0 : i32
    %c0_i32_0 = arith.constant 0 : i32
    %c0_i32_1 = arith.constant 0 : i32
    return %arg0, %c0_i32, %arg1, %c0_i32_0 : i32, i32, i32, i32
  }
}

</mosaic_0001>

<bundles_post_ra>
// kernel: two_forward_one_back_forward.1
= control target key start
LH: loop header
LB: loop body
LE: loop exit
PB: predicated region body
PF: predicated region fallthrough
CT: control target
= control target key end

     0   :  { %s2057_s0 = inlined_call_operand.vmem [shape: f32[2,8,16], index: 0, kind: input, shape index: {}]   ;;  %s2058_s1 = inlined_call_operand.vmem [shape: bf16[16,128], index: 1, kind: input, shape index: {}]   ;;  %s2059_s2 = inlined_call_operand.vmem [shape: f32[1,128], index: 2, kind: input, shape index: {}]   ;;  %s2060_s3 = inlined_call_operand.vmem [shape: bf16[128,16], index: 3, kind: input, shape index: {}]   ;;  %s2061_s4 = inlined_call_operand.vmem [shape: f32[1,16], index: 4, kind: input, shape index: {}]   ;;  %s2062_s5 = inlined_call_operand.vmem [shape: bf16[16,256], index: 5, kind: input, shape index: {}]   ;;  %s2063_s6 = inlined_call_operand.vmem [shape: f32[1,128], index: 6, kind: input, shape index: {}]   ;;  %s2064_s7 = inlined_call_operand.vmem [shape: bf16[128,16], index: 7, kind: input, shape index: {}]   ;;  %s2065_s8 = inlined_call_operand.vmem [shape: f32[1,16], index: 8, kind: input, shape index: {}]   ;;  %s2066_s9 = inlined_call_operand.vmem [shape: bf16[16,128], index: 9, kind: input, shape index: {}]   ;;  %s2067_s10 = inlined_call_operand.vmem [shape: f32[1,128], index: 10, kind: input, shape index: {}]   ;;  %s2068_s11 = inlined_call_operand.vmem [shape: bf16[128,16], index: 11, kind: input, shape index: {}]   ;;  %s2069_s12 = inlined_call_operand.vmem [shape: f32[1,16], index: 12, kind: input, shape index: {}]   ;;  %s2070_s13 = inlined_call_operand.hbm [shape: bf16[2,2,8,16], index: 13, kind: output, shape index: {0}]   ;;  %s2071_s14 = inlined_call_operand.hbm [shape: bf16[2,2,8,16], index: 14, kind: output, shape index: {1}]  }
   0x1   :  { %2078 = sst [smem:[#allocation10_spill]] %s2057_s0 }
   0x2   :  { %2079 = sst [smem:[#allocation11_spill]] %s2058_s1 }
   0x3   :  { %2080 = sst [smem:[#allocation12_spill]] %s2059_s2 }
   0x4   :  { %2081 = sst [smem:[#allocation13_spill]] %s2060_s3 }
   0x5   :  { %20 = vsyncpa [#allocation3], 0 }
   0x6   :  { %22 = vsyncpa [#allocation3 + $0x1], 0 }
   0x7   :  { %23 = vsyncpa [#allocation5], 0 }
   0x8   :  { %25 = vsyncpa [#allocation5 + $0x1], 0  ;;  %s1701_s29 = smov 0   ;;  %s1703_s30 = smov 0  }
   0x9   :  { %s1705_s15 = smov 0   ;;  %s1707_s16 = smov 0  }
   0xa   :  { %s1709_s17 = smov 0   ;;  %s1711_s18 = smov 0  }
   0xb LB: > { %2082 = sst [smem:[#allocation8_spill]] %s1613_s17  ;;  %s1224_s19 = sadd.s32 4294967295, %s1617_s18   ;;  %s1617_s18 = sphi %s1711_s18, %s31_s18   ;;  %s1613_s17 = sphi %s1709_s17, %s2096_s17   ;;  %s1609_s16 = sphi %s1707_s16, %s2095_s16   ;;  %s1605_s15 = sphi %s1705_s15, %s2099_s15   ;;  %s1601_s30 = sphi %s1703_s30, %s2098_s30   ;;  %s1597_s29 = sphi %s1701_s29, %s2097_s29  }
   0xc   : > { %s1225_s20 = sadd.s32 4294967294, %s1617_s18   ;;  %s43_s21 = sadd.s32 1, %s1613_s17 }
   0xd   : > { %s332_s22 = sadd.s32 1, %s1605_s15  ;;  %p45_p0 = scmp.ge.s32.totalorder %s43_s21, 2 }
   0xe   : > { %p342_p1 = scmp.ne.s32.totalorder %s1605_s15, %s1601_s30  ;;  %p343_p2 = scmp.eq.s32.totalorder %s1224_s19, 1 }
   0xf   : > { %p348_p3 = scmp.ne.s32.totalorder %s1601_s30, %s1597_s29  ;;  %s2101_s21 = smov (%p45_p0, %s43_s21), 0 }
  0x10   : > { %2083 = sst [smem:[#allocation9_spill]] %s2101_s21  ;;  %p1741_p4 = por %p343_p2, %p342_p1 }
  0x11   : > { %p349_p5 = scmp.eq.s32.totalorder %s1225_s20, 1  ;;  %s327_s24 = ssub.s32 %s1613_s17, %s2101_s21 }
  0x12   : > { %p1228_p6 = scmp.ge.s32.totalorder %s1617_s18, 1  ;;  %p330_p7 = scmp.eq.s32.totalorder %s327_s24, 0 }
  0x13   : > { %p1748_p8 = por %p349_p5, %p348_p3  ;;  %p441_p9 = scmp.lt.s32.totalorder %s1617_s18, 3 }
  0x14   : > { %s1754_s26 = scalar_select %p330_p7, %s1605_s15, %s332_s22  }
  0x15   : > { %p442_p10 = pnand %p1228_p6, %p441_p9 }
  0x16   : > { %s2086_s1 = sld [smem:[#allocation11_spill]] (!%p442_p10)  ;;  %v1619_v1 = vmov (!%p442_p10), 0.0   ;;  %p494_p11 = scmp.lt.s32.totalorder (!%p442_p10), %s1609_s16, 1  ;;  %vm1620_vm0 = vmmov (!%p442_p10), 0   ;;  %vm519_vm1 = vcmask (!%p442_p10), 130048   ;;  %v1621_v22 = vmov (!%p442_p10), 0  }
  0x17   : > { %445 = sbr.rel (%p442_p10) target bundleno = 1354 (0x54a), region = 72  ;;  %1321 = vmatprep.subr.bf16.mxu1 (!%p442_p10), %v1619_v1  ;;  %1323 = vmatprep.mubr.msk.bf16.mxu1 (!%p442_p10), %vm1620_vm0, %v1619_v1  ;;  %s2087_s0 = sld [smem:[#allocation10_spill]] (!%p442_p10)  ;;  %v1487_v20 = vld [vmem:[%s2062_s5 + $0x4] ss:$8 sps:$4 sm:$0xff] (!%p442_p10)   ;;  %v1489_v21 = vld [vmem:[%s2062_s5] ss:$8 sps:$4 sm:$0xff] (!%p442_p10)  }
  0x18   : > { %s2088_s3 = sld [smem:[#allocation13_spill]] (!%p442_p10)  ;;  %s2089_s2 = sld [smem:[#allocation12_spill]] (!%p442_p10)  ;;  %692 = vmatprep.subr.bf16.mxu0 (!%p442_p10), %v1487_v20  ;;  %724 = vmatprep.mubr.bf16.mxu0 (!%p442_p10), %v1621_v22  ;;  %v1818_v23 = vld [vmem:[%s2068_s11] sm:$0xff] (!%p442_p10)   ;;  %v1825_v24 = vld [vmem:[%s2068_s11 + $0x8] sm:$0xff] (!%p442_p10)   ;;  %v1832_v25 = vld [vmem:[%s2068_s11 + $0x10] sm:$0xff] (!%p442_p10)   ;;  %vm1069_vm2 = vcmask (!%p442_p10), 125952  }
  0x19   : > { %693 = vmatpush1.bf16.msra.mxu0 (!%p442_p10), %v1489_v21  ;;  %v1839_v26 = vld [vmem:[%s2068_s11 + $0x18] sm:$0xff] (!%p442_p10)   ;;  %v1846_v27 = vld [vmem:[%s2068_s11 + $0x20] sm:$0xff] (!%p442_p10)   ;;  %v1853_v28 = vld [vmem:[%s2068_s11 + $0x28] sm:$0xff] (!%p442_p10)   ;;  %s1858_s22 = sand.u32 (!%p442_p10), 1, %s1601_s30  }
  0x1a   : > { %1347 = vmatprep.subr.bf16.mxu0 (!%p442_p10), %v1619_v1  ;;  %v1235_v29 = vld [vmem:[%s2061_s4] ss:$0 sm:$0xff] (!%p442_p10)  ;;  %s2074_s24 = sshll.u32 (!%p442_p10), %s1858_s22, 3  ;;  %v1492_v37 = vld [vmem:[%s2064_s7 + $0x8] sm:$0xff] (!%p442_p10)   ;;  %v1494_v38 = vld [vmem:[%s2064_s7 + $0x10] sm:$0xff] (!%p442_p10)  }
  0x1b   : > { %v1490_v34 = vld [vmem:[%s2064_s7] sm:$0xff] (!%p442_p10)   ;;  %v1496_v39 = vld [vmem:[%s2064_s7 + $0x18] sm:$0xff] (!%p442_p10)   ;;  %v1500_v41 = vld [vmem:[%s2064_s7 + $0x28] sm:$0xff] (!%p442_p10)  }
  0x1c   : > { %v1478_v0 = vld [vmem:[%s2086_s1] sm:$0xff] (!%p442_p10)   ;;  %v1502_v42 = vld [vmem:[%s2064_s7 + $0x30] sm:$0xff] (!%p442_p10)   ;;  %v1504_v44 = vld [vmem:[%s2064_s7 + $0x38] sm:$0xff] (!%p442_p10)  }
  0x1d   : > { %1322 = vmatpush3.bf16.msra.mxu1 (!%p442_p10), %v1478_v0  ;;  %v1498_v40 = vld [vmem:[%s2064_s7 + $0x20] sm:$0xff] (!%p442_p10)   ;;  %v1503_v43 = vld [vmem:[%s2068_s11 + $0x30] sm:$0xff] (!%p442_p10)   ;;  %v1505_v45 = vld [vmem:[%s2068_s11 + $0x38] sm:$0xff] (!%p442_p10)  }
  0x1e   : > { %s495_s19 = scalar_select %p494_p11, %s1609_s16, 1  ;;  %1327 = vmatprep.subr.bf16.mxu1 %v1619_v1  ;;  %v1479_v3 = vld [vmem:[%s2088_s3] sm:$0xff]   ;;  %v1480_v5 = vld [vmem:[%s2088_s3 + $0x8] sm:$0xff]   ;;  %v1481_v6 = vld [vmem:[%s2088_s3 + $0x10] sm:$0xff]  }
  0x1f   : > { %v1482_v7 = vld [vmem:[%s2088_s3 + $0x18] sm:$0xff]   ;;  %v1483_v8 = vld [vmem:[%s2088_s3 + $0x20] sm:$0xff]   ;;  %v1484_v9 = vld [vmem:[%s2088_s3 + $0x28] sm:$0xff]  }
  0x20   : > { %s1231_s20 = sshll.u32 %s495_s19, 3  ;;  %v1485_v10 = vld [vmem:[%s2088_s3 + $0x30] sm:$0xff]   ;;  %v1486_v11 = vld [vmem:[%s2088_s3 + $0x38] sm:$0xff]   ;;  %v1232_v12 = vld [vmem:[%s2089_s2] ss:$0 sm:$0xff]  ;;  %s1869_s19 = scalar_lea.vmem [#allocation2], %s2074_s24 }
  0x21   : > { %s500_s27 = scalar_lea.vmem %s2087_s0, %s1231_s20  ;;  %v1247_v46 = vld [vmem:[%s2063_s6] ss:$0 sm:$0xff]  ;;  %s1098_s20 = sshll.u32 %s1869_s19, 4  ;;  %s1958_s20 = int_to_ptr.vmem [resolvable:$true] %s1098_s20 }
  0x22   : > { %v502_v2 = vld [vmem:[%s500_s27] sm:$0xff]  ;;  %s2090_s27 = sshll.u32 %s1858_s22, 3  ;;  %s2075_s24 = sshll.u32 %s1609_s16, 7 }
  0x23   : > { %v503_v4 = vpack.c.bf16 %v502_v2, %v502_v2  ;;  %v1248_v47 = vld [vmem:[%s2067_s10] ss:$0 sm:$0xff]  ;;  %s1938_s28 = scalar_lea.vmem [#allocation4], %s2090_s27  ;;  %s1966_s0 = scalar_lea.hbm %s2070_s13, %s2075_s24 }
  0x24   : > { %v1506_v56 = vld [vmem:[%s2066_s9] sm:$0xff]   ;;  %s1507_s27 = scalar_lea.vmem %s1958_s20, 128  ;;  %s1622_s2 = smov [#allocation2]  }
  0x25   : > { %1324 = vmatmul.mubr.msk.bf16.vlgmr.msra.gmra.mrb[0].mxu1 %vm519_vm1, %v503_v4  ;;  %v1249_v59 = vld [vmem:[%s2065_s8] ss:$0 sm:$0xff]  ;;  %p1508_p12 = scmp.ne.s32.totalorder %s1958_s20, %s1507_s27 }
  0x26   : > { %1328 = vmatpush3.bf16.msra.mxu1 %v1479_v3  ;;  %1343 = vmatprep.mubr.msk.bf16.mxu1 %vm1620_vm0, %v1619_v1  ;;  %v1930_v60 = vld [vmem:[%s2069_s12] ss:$0 sm:$0xff] }
  0x27   : > { %1329 = vmatprep.subr.bf16.mxu1 %v1619_v1  ;;  %p1509_p13 = pnand %p1508_p12, %p1741_p4 }
  0x29   : > { %p1510_p0 = pneg %p1509_p13 }
  0x2a   : > { %1330 = vmatpush3.bf16.msra.mxu1 %v1480_v5 }
  0x2b   : > { %1331 = vmatprep.subr.bf16.mxu1 %v1619_v1 }
  0x2e   : > { %1332 = vmatpush3.bf16.msra.mxu1 %v1481_v6 }
  0x2f   : > { %1333 = vmatprep.subr.bf16.mxu1 %v1619_v1 }
  0x32   : > { %1334 = vmatpush3.bf16.msra.mxu1 %v1482_v7 }
  0x33   : > { %1335 = vmatprep.subr.bf16.mxu1 %v1619_v1 }
  0x36   : > { %1336 = vmatpush3.bf16.msra.mxu1 %v1483_v8 }
  0x37   : > { %1337 = vmatprep.subr.bf16.mxu1 %v1619_v1 }
  0x3a   : > { %1338 = vmatpush3.bf16.msra.mxu1 %v1484_v9 }
  0x3b   : > { %1339 = vmatprep.subr.bf16.mxu1 %v1619_v1 }
  0x3e   : > { %1340 = vmatpush3.bf16.msra.mxu1 %v1485_v10 }
  0x3f   : > { %1341 = vmatprep.subr.bf16.mxu1 %v1619_v1 }
  0x42   : > { %1342 = vmatpush3.bf16.msra.mxu1 %v1486_v11 }
  0x43   : > { %1367 = vmatprep.subr.bf16.mxu1 %v1619_v1 }
  0xf8   : > { %v557_v13 = vpop.f32.mrb[0].mxu1 }
  0xf9   : > { %v558_v14 = vadd.f32 %v1232_v12, %v557_v13  ;;  %v1325_v15 = vpop.f32.mrb[1].mxu1 }
  0xfa   : > { %v560_v16 = vpop.f32.mrb[2].mxu1 }
  0xfb   : > { %v563_v17 = vmax.f32 %v558_v14, 0.0  ;;  %v1326_v18 = vpop.f32.mrb[3].mxu1 }
  0xfd   : > { %v564_v19 = vpack.c.bf16 %v563_v17, %v563_v17 }
  0xff   : > { %1344 = vmatmul.mubr.bf16.vlgmr.msra.gmra.mrb[4].mxu1 %v564_v19 }
 0x100   : > { %1383 = vmatprep.mubr.msk.bf16.mxu1 %vm1620_vm0, %v1619_v1  ;;  %1368 = vmatpush3.bf16.msra.mxu1 %v1818_v23 }
 0x101   : > { %1369 = vmatprep.subr.bf16.mxu1 %v1619_v1 }
 0x104   : > { %1370 = vmatpush3.bf16.msra.mxu1 %v1825_v24 }
 0x105   : > { %1371 = vmatprep.subr.bf16.mxu1 %v1619_v1 }
 0x108   : > { %1372 = vmatpush3.bf16.msra.mxu1 %v1832_v25 }
 0x109   : > { %1373 = vmatprep.subr.bf16.mxu1 %v1619_v1 }
 0x10c   : > { %1374 = vmatpush3.bf16.msra.mxu1 %v1839_v26 }
 0x10d   : > { %1375 = vmatprep.subr.bf16.mxu1 %v1619_v1 }
 0x110   : > { %1376 = vmatpush3.bf16.msra.mxu1 %v1846_v27 }
 0x111   : > { %1377 = vmatprep.subr.bf16.mxu1 %v1619_v1 }
 0x114   : > { %1378 = vmatpush3.bf16.msra.mxu1 %v1853_v28 }
 0x115   : > { %1379 = vmatprep.subr.bf16.mxu1 %v1619_v1 }
 0x118   : > { %1380 = vmatpush3.bf16.msra.mxu1 %v1503_v43 }
 0x119   : > { %1381 = vmatprep.subr.bf16.mxu1 %v1619_v1 }
 0x11c   : > { %1382 = vmatpush3.bf16.msra.mxu1 %v1505_v45 }
 0x1d2   : > { %v670_v30 = vpop.f32.mrb[4].mxu1 }
 0x1d3   : > { %v671_v31 = vadd.f32 %v1235_v29, %v670_v30  ;;  %v1345_v32 = vpop.f32.mrb[5].mxu1 }
 0x1d4   : > { %v673_v33 = vpop.f32.mrb[6].mxu1 }
 0x1d5   : > { %v676_v35 = vpack.c.bf16 %v671_v31, %v671_v31  ;;  %v1346_v36 = vpop.f32.mrb[7].mxu1 }
 0x1d7   : > { %1070 = vst.msk [vmem:[%s1869_s19] sm:$0xf] %vm1069_vm2, %v676_v35  ;;  %1246 = vmatmul.mubr.msk.bf16.vlgmr.msra.gmra.mrb[0].mxu0 %vm519_vm1, %v676_v35 }
 0x1d8   : > { %1348 = vmatpush3.bf16.msra.mxu0 %v1490_v34  ;;  %1363 = vmatprep.mubr.msk.bf16.mxu0 %vm1620_vm0, %v1619_v1 }
 0x1d9   : > { %1349 = vmatprep.subr.bf16.mxu0 %v1619_v1 }
 0x1dc   : > { %1350 = vmatpush3.bf16.msra.mxu0 %v1492_v37 }
 0x1dd   : > { %1351 = vmatprep.subr.bf16.mxu0 %v1619_v1 }
 0x1e0   : > { %1352 = vmatpush3.bf16.msra.mxu0 %v1494_v38 }
 0x1e1   : > { %1353 = vmatprep.subr.bf16.mxu0 %v1619_v1 }
 0x1e4   : > { %1354 = vmatpush3.bf16.msra.mxu0 %v1496_v39 }
 0x1e5   : > { %1355 = vmatprep.subr.bf16.mxu0 %v1619_v1 }
 0x1e8   : > { %1356 = vmatpush3.bf16.msra.mxu0 %v1498_v40 }
 0x1e9   : > { %1357 = vmatprep.subr.bf16.mxu0 %v1619_v1 }
 0x1ec   : > { %1358 = vmatpush3.bf16.msra.mxu0 %v1500_v41 }
 0x1ed   : > { %1359 = vmatprep.subr.bf16.mxu0 %v1619_v1 }
 0x1f0   : > { %1360 = vmatpush3.bf16.msra.mxu0 %v1502_v42 }
 0x1f1   : > { %1361 = vmatprep.subr.bf16.mxu0 %v1619_v1 }
 0x1f4   : > { %1362 = vmatpush3.bf16.msra.mxu0 %v1504_v44 }
 0x1f5   : > { %1387 = vmatprep.subr.bf16.mxu0 %v1619_v1 }
 0x2aa   : > { %v726_v48 = vpop.f32.mrb[0].mxu0 }
 0x2ab   : > { %v740_v49 = vadd.f32 %v1247_v46, %v726_v48  ;;  %v728_v50 = vpop.f32.mrb[1].mxu0 }
 0x2ac   : > { %v749_v51 = vadd.f32 %v1248_v47, %v728_v50  ;;  %v730_v52 = vpop.f32.mrb[2].mxu0 }
 0x2ad   : > { %v741_v53 = vmax.f32 %v740_v49, 0.0  ;;  %v731_v54 = vpop.f32.mrb[3].mxu0 }
 0x2ae   : > { %v750_v55 = vmax.f32 %v749_v51, 0.0 }
 0x2af   : > { %v751_v57 = vpack.c.bf16 %v741_v53, %v741_v53 }
 0x2b0   : > { %v864_v58 = vpack.c.bf16 %v750_v55, %v750_v55 }
 0x2b1   : > { %1364 = vmatmul.mubr.bf16.vlgmr.msra.gmra.mrb[4].mxu0 %v751_v57 }
 0x2b2   : > { %1384 = vmatmul.mubr.bf16.vlgmr.msra.gmra.mrb[8].mxu1 %v864_v58  ;;  %1388 = vmatpush3.bf16.msra.mxu0 %v1506_v56 }
 0x2b3   : > { %1389 = vmatprep.mubr.msk.bf16.mxu0 %vm1620_vm0, %v1619_v1  ;;  %1393 = vmatprep.subr.bf16.mxu0 %v1619_v1 }
 0x384   : > { %v857_v61 = vpop.f32.mrb[4].mxu0 }
 0x385   : > { %v858_v62 = vadd.f32 %v1249_v59, %v857_v61  ;;  %v1365_v63 = vpop.f32.mrb[5].mxu0  ;;  %v970_v0 = vpop.f32.mrb[8].mxu1 }
 0x386   : > { %v971_v2 = vadd.f32 %v1930_v60, %v970_v0  ;;  %v860_v3 = vpop.f32.mrb[6].mxu0  ;;  %v1385_v4 = vpop.f32.mrb[9].mxu1 }
 0x387   : > { %v863_v5 = vpack.c.bf16 %v858_v62, %v858_v62  ;;  %v1366_v6 = vpop.f32.mrb[7].mxu0  ;;  %v973_v7 = vpop.f32.mrb[10].mxu1 }
 0x388   : > { %v1073_v8 = vpack.c.bf16 %v971_v2, %v971_v2  ;;  %v1386_v9 = vpop.f32.mrb[11].mxu1 }
 0x389   : > { %1269 = vst.msk [vmem:[%s1869_s19 + $0x4] sm:$0xf] %vm1069_vm2, %v863_v5  ;;  %1390 = vmatmul.mubr.msk.bf16.vlgmr.msra.gmra.mrb[8].mxu0 %vm519_vm1, %v863_v5  ;;  %s1511_s19 = sshll.u32 %s1622_s2, 4  ;;  %s1512_s19 = int_to_ptr.vmem [resolvable:$false] %s1511_s19 }
 0x38a   : > { %1074 = vst.msk [vmem:[%s1938_s28] sm:$0xf] %vm1069_vm2, %v1073_v8  ;;  %1394 = vmatpush3.bf16.msra.mxu0 %v1818_v23  ;;  %1409 = vmatprep.mubr.msk.bf16.mxu0 %vm1620_vm0, %v1619_v1  ;;  %s1513_s3 = scalar_lea.vmem %s1512_s19, 256  ;;  %p1514_p1 = scmp.lt.s32.totalorder %s1958_s20, %s1512_s19 }
 0x38b   : > { %1395 = vmatprep.subr.bf16.mxu0 %v1619_v1  ;;  %p1515_p2 = scmp.lt.s32.totalorder %s1513_s3, %s1507_s27 }
 0x38d   : > { %p1516_p3 = por %p1515_p2, %p1514_p1 }
 0x38e   : > { %1396 = vmatpush3.bf16.msra.mxu0 %v1825_v24 }
 0x38f   : > { %1397 = vmatprep.subr.bf16.mxu0 %v1619_v1  ;;  %p1517_p5 = pnand %p1516_p3, %p1510_p0 }
 0x392   : > { %1398 = vmatpush3.bf16.msra.mxu0 %v1832_v25 }
 0x393   : > { %1399 = vmatprep.subr.bf16.mxu0 %v1619_v1 }
 0x396   : > { %1400 = vmatpush3.bf16.msra.mxu0 %v1839_v26 }
 0x397   : > { %1401 = vmatprep.subr.bf16.mxu0 %v1619_v1 }
 0x39a   : > { %1402 = vmatpush3.bf16.msra.mxu0 %v1846_v27 }
 0x39b   : > { %1403 = vmatprep.subr.bf16.mxu0 %v1619_v1 }
 0x39e   : > { %1404 = vmatpush3.bf16.msra.mxu0 %v1853_v28 }
 0x39f   : > { %1405 = vmatprep.subr.bf16.mxu0 %v1619_v1 }
 0x3a2   : > { %1406 = vmatpush3.bf16.msra.mxu0 %v1503_v43 }
 0x3a3   : > { %1407 = vmatprep.subr.bf16.mxu0 %v1619_v1 }
 0x3a6   : > { %1408 = vmatpush3.bf16.msra.mxu0 %v1505_v45 }
 0x45c   : > { %v1021_v10 = vpop.f32.mrb[8].mxu0 }
 0x45d   : > { %v1022_v11 = vadd.f32 %v1248_v47, %v1021_v10  ;;  %v1391_v12 = vpop.f32.mrb[9].mxu0 }
 0x45e   : > { %v1024_v13 = vpop.f32.mrb[10].mxu0 }
 0x45f   : > { %v1027_v14 = vmax.f32 %v1022_v11, 0.0  ;;  %v1392_v15 = vpop.f32.mrb[11].mxu0 }
 0x461   : > { %v1028_v16 = vpack.c.bf16 %v1027_v14, %v1027_v14 }
 0x463   : > { %1410 = vmatmul.mubr.bf16.vlgmr.msra.gmra.mrb[12].mxu0 %v1028_v16 }
 0x464   : > { %1520 = shalt.err (!%p1517_p5)
}
 0x465   : > { %s1521_s1 = scalar_lea.hbm %s1966_s0, 128  ;;  %s1525_s2 = scalar_lea.hbm %s2070_s13, 256 }
 0x466   : > { %p1522_p6 = scmp.ne.s32.totalorder %s1966_s0, %s1521_s1  ;;  %p1526_p10 = scmp.lt.u32.totalorder %s1966_s0, %s2070_s13 }
 0x467   : > { %p1527_p11 = scmp.lt.u32.totalorder %s1525_s2, %s1521_s1  ;;  %p1529_p13 = scmp.lt.u32.totalorder %s1521_s1, %s1966_s0 }
 0x468   : > { %p1523_p7 = pnand %p1522_p6, %p1741_p4 }
 0x469   : > { %p1528_p12 = por %p1527_p11, %p1526_p10 }
 0x46a   : > { %p1524_p9 = pneg %p1523_p7 }
 0x46b   : > { %p1530_p0 = por %p1529_p13, %p1528_p12 }
 0x46d   : > { %p1531_p1 = pnand %p1530_p0, %p1524_p9 }
 0x46f   : > { %1534 = shalt.err (!%p1531_p1)
}
 0x470   : > { %s2076_s3 = smov 64   ;;  %s2077_s24 = smov 4  }
 0x471   : > { %s2091_s21 = scalar_lea.sflag [#allocation3], %s1858_s22  ;;  %s1115_s27 = sshll.u32 %s1938_s28, 4  ;;  %s1997_s27 = int_to_ptr.vmem [resolvable:$true] %s1115_s27 }
 0x472   : > { %1413 = dma.vmem_to_hbm [thread:$0]  (%p1741_p4), %s1958_s20, 128, %s1966_s0, %s2091_s21, %s2076_s3, %s2076_s3, %s2077_s24  }
 0x473   : > { %s2092_s1 = sshll.u32 %s1609_s16, 7  ;;  %s1084_s20 = scalar_lea.sflag [#allocation5], %s1858_s22 }
 0x474   : > { %s2004_s19 = scalar_lea.hbm %s2071_s14, %s2092_s1  ;;  %s1535_s0 = scalar_lea.vmem %s1997_s27, 128 }
 0x475   : > { %p1536_p2 = scmp.ne.s32.totalorder %s1997_s27, %s1535_s0  ;;  %s1625_s21 = smov [#allocation4]  }
 0x476   : > { %s1539_s3 = sshll.u32 %s1625_s21, 4  ;;  %s1540_s3 = int_to_ptr.vmem [resolvable:$false] %s1539_s3 }
 0x477   : > { %p1537_p3 = pnand %p1536_p2, %p1741_p4  ;;  %s1541_s24 = scalar_lea.vmem %s1540_s3, 256 }
 0x478   : > { %p1542_p6 = scmp.lt.s32.totalorder %s1997_s27, %s1540_s3  ;;  %p1543_p7 = scmp.lt.s32.totalorder %s1541_s24, %s1535_s0 }
 0x479   : > { %p1538_p5 = pneg %p1537_p3 }
 0x47a   : > { %p1544_p9 = por %p1543_p7, %p1542_p6 }
 0x47c   : > { %p1545_p10 = pnand %p1544_p9, %p1538_p5 }
 0x536   : > { %v1063_v1 = vpop.f32.mrb[12].mxu0 }
 0x537   : > { %v1064_v17 = vadd.f32 %v1930_v60, %v1063_v1  ;;  %v1411_v18 = vpop.f32.mrb[13].mxu0 }
 0x538   : > { %v1066_v19 = vpop.f32.mrb[14].mxu0 }
 0x539   : > { %v1075_v20 = vpack.c.bf16 %v1064_v17, %v1064_v17  ;;  %v1412_v21 = vpop.f32.mrb[15].mxu0 }
 0x53b   : > { %1270 = vst.msk [vmem:[%s1938_s28 + $0x4] sm:$0xf] %vm1069_vm2, %v1075_v20 }
 0x53c   : > { %1548 = shalt.err (!%p1545_p10)
}
 0x53d   : > { %s1549_s16 = scalar_lea.hbm %s2004_s19, 128  ;;  %s1553_s17 = scalar_lea.hbm %s2071_s14, 256 }
 0x53e   : > { %p1550_p11 = scmp.ne.s32.totalorder %s2004_s19, %s1549_s16  ;;  %p1554_p0 = scmp.lt.u32.totalorder %s2004_s19, %s2071_s14 }
 0x53f   : > { %p1555_p1 = scmp.lt.u32.totalorder %s1553_s17, %s1549_s16  ;;  %p1557_p3 = scmp.lt.u32.totalorder %s1549_s16, %s2004_s19 }
 0x540   : > { %p1551_p12 = pnand %p1550_p11, %p1741_p4 }
 0x541   : > { %p1556_p2 = por %p1555_p1, %p1554_p0 }
 0x542   : > { %p1552_p13 = pneg %p1551_p12 }
 0x543   : > { %p1558_p5 = por %p1557_p3, %p1556_p2 }
 0x545   : > { %p1559_p6 = pnand %p1558_p5, %p1552_p13 }
 0x547   : > { %1562 = shalt.err (!%p1559_p6)
}
 0x548   : > { %s2093_s24 = smov 4   ;;  %s2094_s0 = smov 64  }
 0x549   : > { %1414 = dma.vmem_to_hbm [thread:$0]  (%p1741_p4), %s1997_s27, 128, %s2004_s19, %s1084_s20, %s2094_s0, %s2094_s0, %s2093_s24  }
 0x54a PF: > { %p1424_p7 = scmp.ge.s32.totalorder %s1617_s18, 2  ;;  %s1130_s21 = sand.u32 1, %s1597_s29  }
 0x54b   : > { %s1131_s16 = scalar_lea.sflag [#allocation3], %s1130_s21 }
 0x54c   : > { %p1418_p9 = pnand %p1424_p7, %p1748_p8 }
 0x54e   : > { %1588 = dma.done.wait (!%p1418_p9), %s1131_s16, 128  }
 0x54f   : > { %1590 = vsyncadd (!%p1418_p9), %s1131_s16, 4294967168  ;;  %s1140_s23 = scalar_lea.sflag [#allocation5], %s1130_s21 }
 0x550   : > { %1592 = dma.done.wait (!%p1418_p9), %s1140_s23, 128  }
 0x551   : > { %1594 = vsyncadd (!%p1418_p9), %s1140_s23, 4294967168  ;;  %s31_s18 = sadd.s32 1, %s1617_s18   ;;  %s2095_s16 = sld [smem:[#allocation8_spill]] }
 0x552   : > { %p28_p10 = scmp.ge.s32.totalorder %s31_s18, 4   ;;  %s2096_s17 = sld [smem:[#allocation9_spill]] }
 0x553   : > { %s2097_s29 = smov %s1601_s30  ;;  %s2098_s30 = smov %s1605_s15 }
 0x554   : > { %s2099_s15 = smov %s1754_s26  ;;  %30 = sbr.rel (!%p28_p10) target bundleno = 11 (0xb), region = 126 }
 0x55b   :  { %1145 = vsyncpa [#allocation3], 1 }
 0x55c   :  { %1147 = vsyncpa [#allocation3 + $0x1], 1 }
 0x55d   :  { %1148 = vsyncpa [#allocation5], 1 }
 0x55e   :  { %1150 = vsyncpa [#allocation5 + $0x1], 1 }

</bundles_post_ra>
